<compile_context>
chip_gen: v5e
topology: v5e:2x2
jax: 0.10.0
libtpu: 0.0.40
codegen_flags: <defaults>
</compile_context>

<pallas_src>
import jax
import jax.numpy as jnp
import numpy as np
from jax import lax
from jax.experimental import pallas as pl
from jax.experimental.pallas import tpu as pltpu


# Contract x dim 1 (In) with W dim 1 (In):  x (B, tk) . W (tn, tk) -> (B, tn)
_DIMS = (((1,), (1,)), ((), ()))


def _noisy_linear_kernel(x_ref, muW_ref, sigW_ref, epsp_ref, epsq_ref,
                         mub_ref, sigb_ref, o_ref, acc_ref):
    k = pl.program_id(1)

    @pl.when(k == 0)
    def _init():
        acc_ref[...] = jnp.zeros_like(acc_ref)

    x = x_ref[...]                                                  # (B, tk)
    y_mu = lax.dot_general(x, muW_ref[...], _DIMS,
                           preferred_element_type=jnp.float32)      # (B, tn)
    y_sig = lax.dot_general(x * epsp_ref[...], sigW_ref[...], _DIMS,
                            preferred_element_type=jnp.float32)     # (B, tn)
    acc_ref[...] += y_mu + epsq_ref[...] * y_sig

    @pl.when(k == pl.num_programs(1) - 1)
    def _epilogue():
        # Bias (and its broadcast) only once, in the epilogue.
        bias = mub_ref[...] + sigb_ref[...] * epsq_ref[...]          # (1, tn)
        o_ref[...] = (acc_ref[...] + bias).astype(o_ref.dtype)


def _plain_linear_kernel(x_ref, muW_ref, mub_ref, o_ref, acc_ref):
    k = pl.program_id(1)

    @pl.when(k == 0)
    def _init():
        acc_ref[...] = jnp.zeros_like(acc_ref)

    acc_ref[...] += lax.dot_general(x_ref[...], muW_ref[...], _DIMS,
                                    preferred_element_type=jnp.float32)

    @pl.when(k == pl.num_programs(1) - 1)
    def _epilogue():
        o_ref[...] = (acc_ref[...] + mub_ref[...]).astype(o_ref.dtype)


def _pick_tile(dim, candidates=(512, 256, 128)):
    """Largest preferred tile that divides `dim`, else a full-extent block."""
    for t in candidates:
        if dim % t == 0:
            return t
    return dim


def noisy_linear(x, mu_W, sigma_W, mu_bias, sigma_bias, eps_p, eps_q,
                 noise_mode=True):
    """x: (B, In); mu_W/sigma_W: (Out, In); mu_bias/sigma_bias/eps_q: (Out,);
    eps_p: (In,).  Returns (B, Out) float32."""
    B, In = x.shape
    Out, In2 = mu_W.shape
    assert In2 == In

    tn = _pick_tile(Out)
    tk = _pick_tile(In)
    grid = (Out // tn, In // tk)

    x = x.astype(jnp.float32)
    mu_W = jnp.asarray(mu_W, jnp.float32)              # native (Out, In) layout
    mu_b = mu_bias.reshape(1, Out).astype(jnp.float32)

    x_spec = pl.BlockSpec((B, tk), lambda j, k: (0, k))
    w_spec = pl.BlockSpec((tn, tk), lambda j, k: (j, k))
    row_out_spec = pl.BlockSpec((1, tn), lambda j, k: (0, j))
    row_in_spec = pl.BlockSpec((1, tk), lambda j, k: (0, k))
    o_spec = pl.BlockSpec((B, tn), lambda j, k: (0, j))

    compiler_params = pltpu.CompilerParams(
        dimension_semantics=("parallel", "arbitrary"),
        vmem_limit_bytes=32 * 1024 * 1024,
    )
    scratch = [pltpu.VMEM((B, tn), jnp.float32)]
    out_shape = jax.ShapeDtypeStruct((B, Out), jnp.float32)

    if not noise_mode:
        # Deterministic path: plain linear; sigma_W / eps never read from HBM.
        return pl.pallas_call(
            _plain_linear_kernel,
            out_shape=out_shape,
            grid_spec=pltpu.PrefetchScalarGridSpec(
                num_scalar_prefetch=0, grid=grid,
                in_specs=[x_spec, w_spec, row_out_spec],
                out_specs=o_spec,
                scratch_shapes=scratch),
            compiler_params=compiler_params,
        )(x, mu_W, mu_b)

    sigma_W = jnp.asarray(sigma_W, jnp.float32)
    eps_p_r = eps_p.reshape(1, In).astype(jnp.float32)
    eps_q_r = eps_q.reshape(1, Out).astype(jnp.float32)
    sig_b = sigma_bias.reshape(1, Out).astype(jnp.float32)

    return pl.pallas_call(
        _noisy_linear_kernel,
        out_shape=out_shape,
        grid_spec=pltpu.PrefetchScalarGridSpec(
            num_scalar_prefetch=0, grid=grid,
            in_specs=[x_spec, w_spec, w_spec, row_in_spec, row_out_spec,
                      row_out_spec, row_out_spec],
            out_specs=o_spec,
            scratch_shapes=scratch),
        compiler_params=compiler_params,
    )(x, mu_W, sigma_W, eps_p_r, eps_q_r, mu_b, sig_b)


def _f(x):
    # torch: x.normal_().sign().mul(x.abs().sqrt())
    return jnp.sign(x) * jnp.sqrt(jnp.abs(x))


def init_noisy_linear_params(key, in_features, out_features, sigma=0.5):
    k1, k2, k3, k4 = jax.random.split(key, 4)
    bound = 1.0 / np.sqrt(in_features)
    mu_W = jax.random.uniform(k1, (out_features, in_features), jnp.float32,
                              -bound, bound)
    mu_bias = jax.random.uniform(k2, (out_features,), jnp.float32, -bound, bound)
    sigma_W = jnp.full((out_features, in_features),
                       sigma / np.sqrt(in_features), jnp.float32)
    sigma_bias = jnp.full((out_features,),
                          sigma / np.sqrt(out_features), jnp.float32)
    eps_p = _f(jax.random.normal(k3, (in_features,), jnp.float32))
    eps_q = _f(jax.random.normal(k4, (out_features,), jnp.float32))
    return mu_W, sigma_W, mu_bias, sigma_bias, eps_p, eps_q


def _reference(x, mu_W, sigma_W, mu_bias, sigma_bias, eps_p, eps_q, noise_mode):
    if noise_mode:
        weight = mu_W + sigma_W * jnp.outer(eps_q, eps_p)
        bias = mu_bias + sigma_bias * eps_q
    else:
        weight = mu_W
        bias = mu_bias
    return x @ weight.T + bias


if __name__ == "__main__":
    key = jax.random.PRNGKey(0)

    # Test 1: small shapes (full-extent blocks, grid = (1, 1)).
    # Test 2: 128-aligned shapes that exercise the tiled (Out, K) grid.
    for (B, In, Out) in [(8, 32, 64), (8, 256, 256)]:
        kx, kp, key = jax.random.split(key, 3)
        x = jax.random.normal(kx, (B, In), jnp.float32)
        params = init_noisy_linear_params(kp, In, Out, sigma=0.5)
        mu_W, sigma_W, mu_bias, sigma_bias, eps_p, eps_q = params

        for noise_mode in (True, False):
            y = noisy_linear(x, mu_W, sigma_W, mu_bias, sigma_bias,
                             eps_p, eps_q, noise_mode=noise_mode)
            y = jax.block_until_ready(y)
            y_ref = _reference(x, mu_W, sigma_W, mu_bias, sigma_bias,
                               eps_p, eps_q, noise_mode)
            np.testing.assert_allclose(np.asarray(y), np.asarray(y_ref),
                                       rtol=1e-5, atol=1e-4)

    print("KERNEL_OK")
</pallas_src>

<mosaic_0001>
module attributes {stable_mosaic.version = 11 : i64} {
  func.func @_noisy_linear_kernel(%arg0: i32, %arg1: i32, %arg2: memref<8x32xf32, #tpu.memory_space<vmem>>, %arg3: memref<64x32xf32, #tpu.memory_space<vmem>>, %arg4: memref<64x32xf32, #tpu.memory_space<vmem>>, %arg5: memref<1x32xf32, #tpu.memory_space<vmem>>, %arg6: memref<1x64xf32, #tpu.memory_space<vmem>>, %arg7: memref<1x64xf32, #tpu.memory_space<vmem>>, %arg8: memref<1x64xf32, #tpu.memory_space<vmem>>, %arg9: memref<8x64xf32, #tpu.memory_space<vmem>>, %arg10: memref<8x64xf32, #tpu.memory_space<vmem>>) attributes {dimension_semantics = [#tpu.dimension_semantics<parallel>, #tpu.dimension_semantics<arbitrary>], iteration_bounds = array<i64: 1, 1>, scalar_prefetch = 0 : i64, scratch_operands = 1 : i64, tpu.core_type = #tpu.core_type<tc>, window_params = [{transform_indices = @transform_0, window_bounds = array<i64: 8, 32>}, {transform_indices = @transform_1, window_bounds = array<i64: 64, 32>}, {transform_indices = @transform_2, window_bounds = array<i64: 64, 32>}, {transform_indices = @transform_3, window_bounds = array<i64: 1, 32>}, {transform_indices = @transform_4, window_bounds = array<i64: 1, 64>}, {transform_indices = @transform_5, window_bounds = array<i64: 1, 64>}, {transform_indices = @transform_6, window_bounds = array<i64: 1, 64>}, {transform_indices = @transform_7, window_bounds = array<i64: 8, 64>}]} {
    %c0_i32 = arith.constant 0 : i32
    %0 = arith.cmpi eq, %arg1, %c0_i32 : i32
    %1 = arith.extui %0 : i1 to i32
    %c0_i32_0 = arith.constant 0 : i32
    %2 = arith.cmpi ne, %1, %c0_i32_0 : i32
    scf.if %2 {
      %cst_17 = arith.constant 0.000000e+00 : f32
      %21 = vector.broadcast %cst_17 : f32 to vector<8x64xf32>
      %c0_18 = arith.constant 0 : index
      %c0_19 = arith.constant 0 : index
      %22 = vector.load %arg10[%c0_18, %c0_19] : memref<8x64xf32, #tpu.memory_space<vmem>>, vector<8x64xf32>
      tpu.vector_store %arg10[%c0_18, %c0_19], %21 {strides = array<i32>} : memref<8x64xf32, #tpu.memory_space<vmem>>, vector<8x64xf32>,
    } else {
    }
    %c0 = arith.constant 0 : index
    %c0_1 = arith.constant 0 : index
    %3 = vector.load %arg2[%c0, %c0_1] : memref<8x32xf32, #tpu.memory_space<vmem>>, vector<8x32xf32>
    %c0_2 = arith.constant 0 : index
    %c0_3 = arith.constant 0 : index
    %4 = vector.load %arg3[%c0_2, %c0_3] : memref<64x32xf32, #tpu.memory_space<vmem>>, vector<64x32xf32>
    %cst = arith.constant dense<0.000000e+00> : vector<8x64xf32>
    %5 = tpu.matmul %3, %4, %cst {dimension_numbers = #tpu.dot_dimension_numbers<[1], [1], [0], [0], [0, 0, 1, 0], [], []>} : vector<8x32xf32>, vector<64x32xf32>, vector<8x64xf32> -> vector<8x64xf32>
    %c0_4 = arith.constant 0 : index
    %c0_5 = arith.constant 0 : index
    %6 = vector.load %arg5[%c0_4, %c0_5] : memref<1x32xf32, #tpu.memory_space<vmem>>, vector<1x32xf32>
    %7 = vector.broadcast %6 : vector<1x32xf32> to vector<8x32xf32>
    %8 = arith.mulf %3, %7 : vector<8x32xf32>
    %c0_6 = arith.constant 0 : index
    %c0_7 = arith.constant 0 : index
    %9 = vector.load %arg4[%c0_6, %c0_7] : memref<64x32xf32, #tpu.memory_space<vmem>>, vector<64x32xf32>
    %cst_8 = arith.constant dense<0.000000e+00> : vector<8x64xf32>
    %10 = tpu.matmul %8, %9, %cst_8 {dimension_numbers = #tpu.dot_dimension_numbers<[1], [1], [0], [0], [0, 0, 1, 0], [], []>} : vector<8x32xf32>, vector<64x32xf32>, vector<8x64xf32> -> vector<8x64xf32>
    %c0_9 = arith.constant 0 : index
    %c0_10 = arith.constant 0 : index
    %11 = vector.load %arg10[%c0_9, %c0_10] : memref<8x64xf32, #tpu.memory_space<vmem>>, vector<8x64xf32>
    %c0_11 = arith.constant 0 : index
    %c0_12 = arith.constant 0 : index
    %12 = vector.load %arg6[%c0_11, %c0_12] : memref<1x64xf32, #tpu.memory_space<vmem>>, vector<1x64xf32>
    %13 = vector.broadcast %12 : vector<1x64xf32> to vector<8x64xf32>
    %14 = arith.mulf %13, %10 : vector<8x64xf32>
    %15 = arith.addf %5, %14 : vector<8x64xf32>
    %16 = arith.addf %11, %15 : vector<8x64xf32>
    %c0_13 = arith.constant 0 : index
    %c0_14 = arith.constant 0 : index
    %17 = vector.load %arg10[%c0_13, %c0_14] : memref<8x64xf32, #tpu.memory_space<vmem>>, vector<8x64xf32>
    tpu.vector_store %arg10[%c0_13, %c0_14], %16 {strides = array<i32>} : memref<8x64xf32, #tpu.memory_space<vmem>>, vector<8x64xf32>,
    %c0_i32_15 = arith.constant 0 : i32
    %18 = arith.cmpi eq, %arg1, %c0_i32_15 : i32
    %19 = arith.extui %18 : i1 to i32
    %c0_i32_16 = arith.constant 0 : i32
    %20 = arith.cmpi ne, %19, %c0_i32_16 : i32
    scf.if %20 {
      %c0_17 = arith.constant 0 : index
      %c0_18 = arith.constant 0 : index
      %21 = vector.load %arg7[%c0_17, %c0_18] : memref<1x64xf32, #tpu.memory_space<vmem>>, vector<1x64xf32>
      %c0_19 = arith.constant 0 : index
      %c0_20 = arith.constant 0 : index
      %22 = vector.load %arg8[%c0_19, %c0_20] : memref<1x64xf32, #tpu.memory_space<vmem>>, vector<1x64xf32>
      %c0_21 = arith.constant 0 : index
      %c0_22 = arith.constant 0 : index
      %23 = vector.load %arg6[%c0_21, %c0_22] : memref<1x64xf32, #tpu.memory_space<vmem>>, vector<1x64xf32>
      %24 = arith.mulf %22, %23 : vector<1x64xf32>
      %25 = arith.addf %21, %24 : vector<1x64xf32>
      %c0_23 = arith.constant 0 : index
      %c0_24 = arith.constant 0 : index
      %26 = vector.load %arg10[%c0_23, %c0_24] : memref<8x64xf32, #tpu.memory_space<vmem>>, vector<8x64xf32>
      %27 = vector.broadcast %25 : vector<1x64xf32> to vector<8x64xf32>
      %28 = arith.addf %26, %27 : vector<8x64xf32>
      %c0_25 = arith.constant 0 : index
      %c0_26 = arith.constant 0 : index
      %29 = vector.load %arg9[%c0_25, %c0_26] : memref<8x64xf32, #tpu.memory_space<vmem>>, vector<8x64xf32>
      tpu.vector_store %arg9[%c0_25, %c0_26], %28 {strides = array<i32>} : memref<8x64xf32, #tpu.memory_space<vmem>>, vector<8x64xf32>,
    } else {
    }
    return
  }
  func.func @transform_0(%arg0: i32, %arg1: i32) -> (i32, i32) {
    %c0_i32 = arith.constant 0 : i32
    %c0_i32_0 = arith.constant 0 : i32
    return %c0_i32, %arg1 : i32, i32
  }
  func.func @transform_1(%arg0: i32, %arg1: i32) -> (i32, i32) {
    %c0_i32 = arith.constant 0 : i32
    return %arg0, %arg1 : i32, i32
  }
  func.func @transform_2(%arg0: i32, %arg1: i32) -> (i32, i32) {
    %c0_i32 = arith.constant 0 : i32
    return %arg0, %arg1 : i32, i32
  }
  func.func @transform_3(%arg0: i32, %arg1: i32) -> (i32, i32) {
    %c0_i32 = arith.constant 0 : i32
    %c0_i32_0 = arith.constant 0 : i32
    return %c0_i32, %arg1 : i32, i32
  }
  func.func @transform_4(%arg0: i32, %arg1: i32) -> (i32, i32) {
    %c0_i32 = arith.constant 0 : i32
    %c0_i32_0 = arith.constant 0 : i32
    return %c0_i32, %arg0 : i32, i32
  }
  func.func @transform_5(%arg0: i32, %arg1: i32) -> (i32, i32) {
    %c0_i32 = arith.constant 0 : i32
    %c0_i32_0 = arith.constant 0 : i32
    return %c0_i32, %arg0 : i32, i32
  }
  func.func @transform_6(%arg0: i32, %arg1: i32) -> (i32, i32) {
    %c0_i32 = arith.constant 0 : i32
    %c0_i32_0 = arith.constant 0 : i32
    return %c0_i32, %arg0 : i32, i32
  }
  func.func @transform_7(%arg0: i32, %arg1: i32) -> (i32, i32) {
    %c0_i32 = arith.constant 0 : i32
    %c0_i32_0 = arith.constant 0 : i32
    return %c0_i32, %arg0 : i32, i32
  }
}

</mosaic_0001>

<bundles_post_ra>
// kernel: tpu_custom_call.1
= control target key start
LH: loop header
LB: loop body
LE: loop exit
PB: predicated region body
PF: predicated region fallthrough
CT: control target
= control target key end

     0   :  { %vm55_vm0 = vcmask 261120   ;;  %s369_s0 = inlined_call_operand.vmem [shape: f32[8,32], index: 0, kind: input, shape index: {}]   ;;  %s370_s1 = inlined_call_operand.vmem [shape: f32[64,32], index: 1, kind: input, shape index: {}]   ;;  %s371_s2 = inlined_call_operand.vmem [shape: f32[64,32], index: 2, kind: input, shape index: {}]   ;;  %s372_s3 = inlined_call_operand.vmem [shape: f32[1,32], index: 3, kind: input, shape index: {}]   ;;  %s373_s4 = inlined_call_operand.vmem [shape: f32[1,64], index: 4, kind: input, shape index: {}]   ;;  %s374_s5 = inlined_call_operand.vmem [shape: f32[1,64], index: 5, kind: input, shape index: {}]   ;;  %s375_s6 = inlined_call_operand.vmem [shape: f32[1,64], index: 6, kind: input, shape index: {}]   ;;  %s376_s7 = inlined_call_operand.hbm [shape: f32[8,64], index: 7, kind: output, shape index: {}]  }
   0x1   :  { %v54_v0 = vld [vmem:[%s371_s2 + $0x38] sm:$0xff]  ;;  %v53_v2 = vld [vmem:[%s371_s2 + $0x30] sm:$0xff]  ;;  %v52_v4 = vld [vmem:[%s371_s2 + $0x28] sm:$0xff] }
   0x2   :  { %v41_v1 = vld [vmem:[%s370_s1 + $0x38] sm:$0xff]  ;;  %189 = vmatpush.xpose.msk.msra.mxu0 %vm55_vm0, %v54_v0  ;;  %v40_v3 = vld [vmem:[%s370_s1 + $0x30] sm:$0xff]  ;;  %v39_v5 = vld [vmem:[%s370_s1 + $0x28] sm:$0xff] }
   0x3   :  { %198 = vmatpush.xpose.msk.msra.mxu1 %vm55_vm0, %v41_v1 }
   0x6   :  { %190 = vmatpush.xpose.msk.msra.mxu0 %vm55_vm0, %v53_v2 }
   0x7   :  { %199 = vmatpush.xpose.msk.msra.mxu1 %vm55_vm0, %v40_v3 }
   0x8   :  { %12 = vsyncpa [#allocation4], 0  ;;  %v51_v6 = vld [vmem:[%s371_s2 + $0x20] sm:$0xff]  ;;  %v50_v8 = vld [vmem:[%s371_s2 + $0x18] sm:$0xff]  ;;  %vm31_vm1 = vcmask 523264   ;;  %v237_v19 = vmov 0.0  }
   0x9   :  { %v38_v7 = vld [vmem:[%s370_s1 + $0x20] sm:$0xff]  ;;  %v37_v9 = vld [vmem:[%s370_s1 + $0x18] sm:$0xff]  ;;  %v49_v10 = vld [vmem:[%s371_s2 + $0x10] sm:$0xff]  ;;  %32 = vst.msk [vmem:[#allocation2] sm:$0xff] %vm31_vm1, %v237_v19  ;;  %s238_s18 = smov [#allocation3]   ;;  %s180_s21 = sshll.u32 %s376_s7, 4  ;;  %s181_s21 = int_to_ptr.hbm [resolvable:$true] %s180_s21 }
   0xa   :  { %191 = vmatpush.xpose.msk.msra.mxu0 %vm55_vm0, %v52_v4  ;;  %v36_v11 = vld [vmem:[%s370_s1 + $0x10] sm:$0xff]  ;;  %v48_v12 = vld [vmem:[%s371_s2 + $0x8] sm:$0xff]  ;;  %v209_v14 = vld [vmem:[%s372_s3] ss:$0 sm:$0xff]  ;;  %s178_s19 = sshll.u32 %s238_s18, 4  ;;  %s179_s19 = int_to_ptr.vmem [resolvable:$true] %s178_s19 }
   0xb   :  { %200 = vmatpush.xpose.msk.msra.mxu1 %vm55_vm0, %v39_v5  ;;  %v35_v13 = vld [vmem:[%s370_s1 + $0x8] sm:$0xff]  ;;  %v33_v15 = vld [vmem:[%s369_s0] sm:$0xff] }
   0xc   :  { %v47_v16 = vld [vmem:[%s371_s2] sm:$0xff]  ;;  %v46_v18 = vmul.f32 %v209_v14, %v33_v15 }
   0xd   :  { %v34_v17 = vld [vmem:[%s370_s1] sm:$0xff] }
   0xe   :  { %192 = vmatpush.xpose.msk.msra.mxu0 %vm55_vm0, %v51_v6  ;;  %v210_v20 = vld [vmem:[%s373_s4] ss:$0 sm:$0xff] }
   0xf   :  { %201 = vmatpush.xpose.msk.msra.mxu1 %vm55_vm0, %v38_v7  ;;  %v163_v23 = vld [vmem:[%s375_s6] sm:$0x1] }
  0x10   :  { %v164_v24 = vld [vmem:[%s373_s4] sm:$0x1] }
  0x11   :  { %v103_v26 = vld [vmem:[#allocation2] sm:$0xff]  ;;  %v165_v28 = vmul.f32 %v164_v24, %v163_v23 }
  0x12   :  { %193 = vmatpush.xpose.msk.msra.mxu0 %vm55_vm0, %v50_v8  ;;  %v162_v29 = vld [vmem:[%s374_s5] sm:$0x1] }
  0x13   :  { %202 = vmatpush.xpose.msk.msra.mxu1 %vm55_vm0, %v37_v9  ;;  %v166_v31 = vadd.f32 %v165_v28, %v162_v29 }
  0x15   :  { %v169_v32 = vperm.slane %v166_v31, 0 }
  0x16   :  { %194 = vmatpush.xpose.msk.msra.mxu0 %vm55_vm0, %v49_v10 }
  0x17   :  { %203 = vmatpush.xpose.msk.msra.mxu1 %vm55_vm0, %v36_v11 }
  0x1a   :  { %195 = vmatpush.xpose.msk.msra.mxu0 %vm55_vm0, %v48_v12 }
  0x1b   :  { %204 = vmatpush.xpose.msk.msra.mxu1 %vm55_vm0, %v35_v13 }
  0x1e   :  { %196 = vmatpush.xpose.msk.msra.mxu0 %vm55_vm0, %v47_v16 }
  0x1f   :  { %205 = vmatpush.xpose.msk.msra.mxu1 %vm55_vm0, %v34_v17 }
  0x21   :  { %197 = vmatmul.msk.f32.vlgmr.msra.gmra.mxu0 %vm55_vm0, %v46_v18 }
  0x22   :  { %206 = vmatmul.msk.f32.vlgmr.msra.gmra.mxu1 %vm55_vm0, %v33_v15 }
  0x9e   :  { %v100_v21 = vpop.f32.mrf.mxu0 }
  0x9f   :  { %v153_v22 = vpop.f32.mrf.mxu1  ;;  %v108_v25 = vmul.f32 %v210_v20, %v100_v21 }
  0xa1   :  { %v154_v27 = vadd.f32 %v153_v22, %v108_v25 }
  0xa3   :  { %v156_v30 = vadd.f32 %v154_v27, %v103_v26 }
  0xa5   :  { %158 = vst.msk [vmem:[#allocation2] sm:$0xff] %vm31_vm1, %v156_v30 }
  0xac   :  { %v167_v33 = vld [vmem:[#allocation2] sm:$0xff] }
  0xad   :  { %v171_v34 = vadd.f32 %v169_v32, %v167_v33 }
  0xaf   :  { %172 = vst.msk [vmem:[#allocation3] sm:$0xff] %vm31_vm1, %v171_v34 }
  0xb0   :  { %183 = dma.vmem_to_hbm [thread:$0]  %s179_s19, 128, %s181_s21, [#allocation4]  }
  0xb1   :  { %235 = dma.done.wait [#allocation4], 128  }
  0xb2   :  { %236 = vsyncadd [#allocation4], 4294967168 }
  0xb3   :  { %188 = vsyncpa [#allocation4], 1 }

</bundles_post_ra>
